<compile_context>
chip_gen: v7x
topology: tpu7x:2x2x1
jax: 0.10.0
libtpu: 0.0.40
codegen_flags: <defaults>
</compile_context>

<pallas_src>
import jax
import jax.numpy as jnp
from jax.experimental import pallas as pl
from jax.experimental.pallas import tpu as pltpu


def _repeat_kernel(x_ref, o_ref):
    # x_ref: one input tile; o_ref: R_BLK stacked copies of that tile.
    o_ref[...] = jnp.broadcast_to(x_ref[...][None], o_ref.shape)


def _largest_divisor(n: int, cap: int, align: int = 1) -> int:
    """Largest divisor of n that is <= cap, preferring multiples of `align`."""
    cap = max(1, min(n, cap))
    fallback = 1
    for cand in range(cap, 0, -1):
        if n % cand == 0:
            if cand % align == 0:
                return cand
            if fallback == 1:
                fallback = cand
    return fallback


def _vmem_capacity_bytes() -> int:
    try:
        return int(pltpu.get_tpu_info().vmem_capacity_bytes)
    except Exception:
        return 64 * 1024 * 1024  # most restrictive generation (v7x, per TC)


def _pick_repeat_block(repeat: int) -> int:
    # Fuse up to 8 repeats per step, but keep >=2 grid steps so v7x's two
    # TensorCores both get work.
    r_blk = _largest_divisor(repeat, 8)
    if repeat // r_blk < 2 and r_blk > 1:
        r_blk = _largest_divisor(repeat, r_blk // 2)
    return r_blk


def repeat_batch(img: jax.Array, repeat: int = 32) -> jax.Array:
    """Equivalent of torch.Tensor.repeat(repeat, 1, 1, 1) on an NCHW tensor."""
    B, C, H, W = img.shape
    F = C * H * W
    N = B * F
    dsize = jnp.dtype(img.dtype).itemsize

    cost = pl.CostEstimate(
        flops=0, transcendentals=0, bytes_accessed=N * dsize * (1 + repeat)
    )
    r_blk = _pick_repeat_block(repeat)

    if N % 1024 == 0:
        # --- fast path: lane-dense (rows, 128) layout, rows % 8 == 0 ---
        rows = N // 128
        vmem_cap = _vmem_capacity_bytes()
        # Double-buffered footprint 2*(in_block + out_block) <= vmem_cap / 2.
        row_cap = (vmem_cap // 4) // (128 * dsize * (1 + r_blk))
        row_cap = max(8, (row_cap // 8) * 8)
        row_tile = _largest_divisor(rows, row_cap, align=8)

        needed = 2 * (1 + r_blk) * row_tile * 128 * dsize
        vmem_limit = int(min(vmem_cap - (4 << 20),
                             max(needed + (4 << 20), 32 << 20)))

        grid = (rows // row_tile, repeat // r_blk)  # repeat axis innermost:
        # input block index is constant along it -> input tile stays resident.
        out = pl.pallas_call(
            _repeat_kernel,
            out_shape=jax.ShapeDtypeStruct((repeat, rows, 128), img.dtype),
            grid=grid,
            in_specs=[pl.BlockSpec((row_tile, 128), lambda j, r: (j, 0))],
            out_specs=pl.BlockSpec(
                (r_blk, row_tile, 128), lambda j, r: (r, j, 0)
            ),
            compiler_params=pltpu.CompilerParams(
                dimension_semantics=("parallel", "parallel"),
                vmem_limit_bytes=vmem_limit,
            ),
            cost_estimate=cost,
        )(img.reshape(rows, 128))
        return out.reshape(repeat * B, C, H, W)

    # --- fallback: full (B, F) blocks (correct for any shape; less dense) ---
    out = pl.pallas_call(
        _repeat_kernel,
        out_shape=jax.ShapeDtypeStruct((repeat, B, F), img.dtype),
        grid=(repeat // r_blk,),
        in_specs=[pl.BlockSpec((B, F), lambda r: (0, 0))],
        out_specs=pl.BlockSpec((r_blk, B, F), lambda r: (r, 0, 0)),
        compiler_params=pltpu.CompilerParams(
            dimension_semantics=("parallel",)
        ),
        cost_estimate=cost,
    )(img.reshape(B, F))
    return out.reshape(repeat * B, C, H, W)


if __name__ == "__main__":
    key = jax.random.PRNGKey(0)
    # Small shapes consistent with an NCHW image batch.
    B, C, H, W = 2, 4, 16, 16
    REPEAT = 8  # module default is 32; small repeat for the demo

    img = jax.random.normal(key, (B, C, H, W), dtype=jnp.float32)

    out = jax.block_until_ready(repeat_batch(img, repeat=REPEAT))

    # Reference: torch's repeat(size, 1, 1, 1) == tile along batch.
    ref = jnp.tile(img, (REPEAT, 1, 1, 1))
    assert out.shape == (REPEAT * B, C, H, W), out.shape
    assert out.dtype == img.dtype
    assert jnp.array_equal(out, ref), "mismatch vs reference tile"

    print("KERNEL_OK")
</pallas_src>

<mosaic_0001>
module attributes {stable_mosaic.version = 11 : i64} {
  func.func @_repeat_kernel(%arg0: i32, %arg1: i32, %arg2: memref<16x128xf32, #tpu.memory_space<vmem>>, %arg3: memref<4x16x128xf32, #tpu.memory_space<vmem>>) attributes {dimension_semantics = [#tpu.dimension_semantics<parallel>, #tpu.dimension_semantics<parallel>], iteration_bounds = array<i64: 1, 2>, scalar_prefetch = 0 : i64, scratch_operands = 0 : i64, tpu.core_type = #tpu.core_type<tc>, window_params = [{transform_indices = @transform_0, window_bounds = array<i64: 16, 128>}, {transform_indices = @transform_1, window_bounds = array<i64: 4, 16, 128>}]} {
    %c0 = arith.constant 0 : index
    %c0_0 = arith.constant 0 : index
    %0 = vector.load %arg2[%c0, %c0_0] : memref<16x128xf32, #tpu.memory_space<vmem>>, vector<16x128xf32>
    %1 = vector.shape_cast %0 : vector<16x128xf32> to vector<1x16x128xf32>
    %2 = vector.shape_cast %1 : vector<1x16x128xf32> to vector<1x16x128xf32>
    %3 = vector.broadcast %2 : vector<1x16x128xf32> to vector<4x16x128xf32>
    %c0_1 = arith.constant 0 : index
    %c0_2 = arith.constant 0 : index
    %c0_3 = arith.constant 0 : index
    %4 = vector.load %arg3[%c0_1, %c0_2, %c0_3] : memref<4x16x128xf32, #tpu.memory_space<vmem>>, vector<4x16x128xf32>
    tpu.vector_store %arg3[%c0_1, %c0_2, %c0_3], %3 {strides = array<i32>} : memref<4x16x128xf32, #tpu.memory_space<vmem>>, vector<4x16x128xf32>,
    return
  }
  func.func @transform_0(%arg0: i32, %arg1: i32) -> (i32, i32) {
    %c0_i32 = arith.constant 0 : i32
    %c0_i32_0 = arith.constant 0 : i32
    return %arg0, %c0_i32 : i32, i32
  }
  func.func @transform_1(%arg0: i32, %arg1: i32) -> (i32, i32, i32) {
    %c0_i32 = arith.constant 0 : i32
    %c0_i32_0 = arith.constant 0 : i32
    return %arg1, %arg0, %c0_i32 : i32, i32, i32
  }
}

</mosaic_0001>

<bundles_post_ra>
// kernel: tpu_custom_call.1
= control target key start
LH: loop header
LB: loop body
LE: loop exit
PB: predicated region body
PF: predicated region fallthrough
CT: control target
= control target key end

     0   :  { %6 = vsyncpa [#allocation3], 0  ;;  %s598_s0 = inlined_call_operand.hbm [shape: f32[16,128], index: 0, kind: input, shape index: {}]   ;;  %s599_s1 = inlined_call_operand.hbm [shape: f32[8,16,128], index: 1, kind: output, shape index: {}]  }
   0x1   :  { %7 = vsyncpa [#allocation4], 0 }
   0x2   :  { %9 = vsyncpa [#allocation4 + $0x1], 0  ;;  %s450_s6 = smov 0   ;;  %s452_s7 = smov 0  }
   0x3   :  { %s454_s8 = smov 0   ;;  %s456_s9 = smov 0  }
   0x4   :  { %s458_s10 = smov 0   ;;  %s460_s11 = smov 0  }
   0x5 LB: > { %s237_s12 = sadd.s32 4294967295, %s432_s11   ;;  %s238_s13 = sadd.s32 4294967294, %s432_s11   ;;  %s432_s11 = sphi %s460_s11, %s15_s11   ;;  %s428_s10 = sphi %s458_s10, %s617_s10   ;;  %s424_s9 = sphi %s456_s9, %s616_s9   ;;  %s420_s8 = sphi %s454_s8, %s615_s8   ;;  %s416_s7 = sphi %s452_s7, %s614_s7   ;;  %s412_s6 = sphi %s450_s6, %s613_s6  }
   0x6   : > { %s24_s14 = sadd.s32 1, %s428_s10  ;;  %s62_s15 = sadd.s32 1, %s420_s8 }
   0x7   : > { %p25_p0 = scmp.ge.s32.totalorder %s24_s14, 2  ;;  %p72_p1 = scmp.ne.s32.totalorder %s420_s8, %s416_s7 }
   0x8   : > { %p73_p2 = scmp.eq.s32.totalorder %s237_s12, 1  ;;  %p78_p3 = scmp.ne.s32.totalorder %s416_s7, %s412_s6 }
   0x9   : > { %s619_s14 = smov (%p25_p0, %s24_s14), 0  ;;  %p79_p5 = scmp.eq.s32.totalorder %s238_s13, 1 }
   0xa   : > { %p490_p4 = por %p73_p2, %p72_p1  ;;  %s57_s17 = ssub.s32 %s428_s10, %s619_s14 }
   0xb   : > { %p239_p6 = scmp.ge.s32.totalorder %s432_s11, 1  ;;  %p60_p7 = scmp.eq.s32.totalorder %s57_s17, 0 }
   0xc   : > { %s604_s16 = scalar_select %p490_p4, 1, 0 }
   0xd   : > { %p497_p8 = por %p79_p5, %p78_p3  ;;  %p86_p9 = scmp.lt.s32.totalorder %s432_s11, 3 }
   0xe   : > { %s503_s19 = scalar_select %p60_p7, %s420_s8, %s62_s15  }
   0xf   : > { %s605_s18 = scalar_select %p497_p8, 1, 0 }
  0x10   : > { %p505_p10 = pnand %p239_p6, %p86_p9  ;;  %p509_p11 = scmp.eq.s32.totalorder %s237_s12, 0 }
  0x11   : > { %s434_s22 = smov [#allocation2]   ;;  %s322_s27 = scalar_lea.hbm %s598_s0, 256 }
  0x12   : > { %s606_s20 = scalar_select %p505_p10, 1, 0 }
  0x13   : > { %s607_s21 = scalar_select %p509_p11, 1, 0 }
  0x14   : > { %p258_p12 = pneg %p505_p10  ;;  %s101_s23 = sshll.u32 %s434_s22, 4  ;;  %s102_s23 = int_to_ptr.vmem [resolvable:$true] %s101_s23 }
  0x15   : > { %p323_p0 = scmp.ne.s32.totalorder %s598_s0, %s322_s27  ;;  %p329_p5 = scmp.lt.u32.totalorder %s322_s27, %s598_s0 }
  0x16   : > { %p517_p13 = pnand %p509_p11, %p258_p12 }
  0x18   : > { %p324_p1 = pneg %p517_p13 }
  0x1a   : > { %p325_p2 = pnand %p324_p1, %p323_p0 }
  0x1c   : > { %p326_p3 = pneg %p325_p2 }
  0x1e   : > { %p331_p6 = pnand %p329_p5, %p326_p3 }
  0x20   : > { %334 = shalt.err (!%p331_p6)
}
  0x21   : > { %s335_s3 = scalar_lea.vmem %s102_s23, 256  ;;  %p343_p8 = scmp.lt.s32.totalorder %s102_s23, %s102_s23 }
  0x22   : > { %p336_p7 = scmp.ne.s32.totalorder %s102_s23, %s335_s3  ;;  %p344_p4 = scmp.lt.s32.totalorder %s335_s3, %s335_s3 }
  0x24   : > { %p338_p9 = pnand %p336_p7, %p324_p1  ;;  %p345_p11 = por %p344_p4, %p343_p8 }
  0x26   : > { %p339_p12 = pneg %p338_p9 }
  0x28   : > { %p346_p10 = pnand %p345_p11, %p339_p12 }
  0x2a   : > { %349 = shalt.err (!%p346_p10)
}
  0x2b   : > { %s435_s4 = smov 128   ;;  %s436_s5 = smov 8  }
  0x2c   : > { %261 = dma.hbm_to_vmem [thread:$0]  (!%p517_p13), %s598_s0, 256, %s102_s23, [#allocation3], %s435_s4, %s435_s4, %s436_s5  }
  0x2d   : > { %p609_p0 = scmp.ne.s32.totalorder %s606_s20, 0 }
  0x2e   : > { %p610_p2 = scmp.ne.s32.totalorder (!%p609_p0), %s607_s21, 0 }
  0x2f   : > { %117 = sbr.rel (%p609_p0) target bundleno = 82 (0x52), region = 24 }
  0x36   : > { %403 = dma.done.wait (%p610_p2), [#allocation3], 256  }
  0x37   : > { %405 = vsyncadd (%p610_p2), [#allocation3], 4294967040  ;;  %s129_s15 = sand.u32 1, %s416_s7   ;;  %s251_s22 = sshll.u32 %s424_s9, 10  ;;  %v135_v0 = vld [vmem:[#allocation2] sm:$0xff]  ;;  %v136_v1 = vld [vmem:[#allocation2 + $0x8] sm:$0xff] }
  0x38   : > { %s243_s17 = sshll.u32 %s129_s15, 6  ;;  %s548_s23 = scalar_lea.hbm %s599_s1, %s251_s22 }
  0x39   : > { %s131_s25 = scalar_lea.vmem [#allocation5], %s243_s17  ;;  %s552_s9 = scalar_lea.sflag [#allocation4], %s129_s15 }
  0x3a   : > { %s162_s24 = sshll.u32 %s131_s25, 4  ;;  %137 = vst [vmem:[%s131_s25] sm:$0xff] %v135_v0  ;;  %139 = vst [vmem:[%s131_s25 + $0x10] sm:$0xff] %v135_v0  ;;  %p611_p8 = scmp.ne.s32.totalorder %s604_s16, 0  ;;  %s550_s24 = int_to_ptr.vmem [resolvable:$true] %s162_s24 }
  0x3b   : > { %141 = vst [vmem:[%s131_s25 + $0x20] sm:$0xff] %v135_v0  ;;  %143 = vst [vmem:[%s131_s25 + $0x30] sm:$0xff] %v135_v0  ;;  %s350_s20 = scalar_lea.vmem %s550_s24, 1024  ;;  %s437_s21 = smov [#allocation5]  }
  0x3c   : > { %138 = vst [vmem:[%s131_s25 + $0x8] sm:$0xff] %v136_v1  ;;  %140 = vst [vmem:[%s131_s25 + $0x18] sm:$0xff] %v136_v1  ;;  %p351_p4 = scmp.ne.s32.totalorder %s550_s24, %s350_s20  ;;  %s354_s28 = sshll.u32 %s437_s21, 4  ;;  %s355_s28 = int_to_ptr.vmem [resolvable:$false] %s354_s28 }
  0x3d   : > { %142 = vst [vmem:[%s131_s25 + $0x28] sm:$0xff] %v136_v1  ;;  %144 = vst [vmem:[%s131_s25 + $0x38] sm:$0xff] %v136_v1  ;;  %s356_s29 = scalar_lea.vmem %s355_s28, 2048  ;;  %p357_p13 = scmp.lt.s32.totalorder %s550_s24, %s355_s28 }
  0x3e   : > { %p352_p10 = pnand %p351_p4, %p611_p8  ;;  %p358_p1 = scmp.lt.s32.totalorder %s356_s29, %s350_s20 }
  0x40   : > { %p353_p11 = pneg %p352_p10  ;;  %p359_p3 = por %p358_p1, %p357_p13 }
  0x42   : > { %p360_p5 = pnand %p359_p3, %p353_p11 }
  0x44   : > { %363 = shalt.err (!%p360_p5)
}
  0x45   : > { %s364_s30 = scalar_lea.hbm %s548_s23, 1024  ;;  %s368_s4 = scalar_lea.hbm %s599_s1, 2048 }
  0x46   : > { %p365_p6 = scmp.ne.s32.totalorder %s548_s23, %s364_s30  ;;  %p369_p12 = scmp.lt.u32.totalorder %s548_s23, %s599_s1 }
  0x47   : > { %p370_p0 = scmp.lt.u32.totalorder %s368_s4, %s364_s30  ;;  %p372_p4 = scmp.lt.u32.totalorder %s364_s30, %s548_s23 }
  0x48   : > { %p366_p7 = pnand %p365_p6, %p611_p8 }
  0x49   : > { %p371_p2 = por %p370_p0, %p369_p12 }
  0x4a   : > { %p367_p9 = pneg %p366_p7 }
  0x4b   : > { %p373_p10 = por %p372_p4, %p371_p2 }
  0x4d   : > { %p374_p11 = pnand %p373_p10, %p367_p9 }
  0x4f   : > { %377 = shalt.err (!%p374_p11)
}
  0x50   : > { %s438_s13 = smov 128   ;;  %s439_s15 = smov 8  }
  0x51   : > { %256 = dma.vmem_to_hbm [thread:$0]  (%p611_p8), %s550_s24, 1024, %s548_s23, %s552_s9, %s438_s13, %s438_s13, %s439_s15  }
  0x52 PF: > { %p268_p13 = scmp.ge.s32.totalorder %s432_s11, 2  ;;  %s177_s17 = sand.u32 1, %s412_s6  }
  0x53   : > { %p612_p1 = scmp.ne.s32.totalorder %s605_s18, 0  ;;  %s178_s22 = scalar_lea.sflag [#allocation4], %s177_s17 }
  0x55   : > { %p263_p3 = pnand %p268_p13, %p612_p1 }
  0x57   : > { %407 = dma.done.wait (!%p263_p3), %s178_s22, 1024  }
  0x58   : > { %409 = vsyncadd (!%p263_p3), %s178_s22, 4294966272  ;;  %s15_s11 = sadd.s32 1, %s432_s11   ;;  %s613_s6 = smov %s416_s7 }
  0x59   : > { %p12_p5 = scmp.ge.s32.totalorder %s15_s11, 4   ;;  %s614_s7 = smov %s420_s8 }
  0x5a   : > { %s615_s8 = smov %s503_s19  ;;  %s616_s9 = smov %s428_s10 }
  0x5b   : > { %s617_s10 = smov %s619_s14  ;;  %14 = sbr.rel (!%p12_p5) target bundleno = 5 (0x5), region = 62 }
  0x62   :  { %183 = vsyncpa [#allocation3], 1 }
  0x63   :  { %185 = vsyncpa [#allocation3 + $0x1], 1 }
  0x64   :  { %186 = vsyncpa [#allocation4], 1 }
  0x65   :  { %188 = vsyncpa [#allocation4 + $0x1], 1 }

</bundles_post_ra>
